<compile_context>
chip_gen: v6e
topology: v6e:2x2x1
jax: 0.10.0
libtpu: 0.0.40
codegen_flags: <defaults>
</compile_context>

<pallas_src>
import functools

import jax
import jax.numpy as jnp
from jax.experimental import pallas as pl
from jax.experimental.pallas import tpu as pltpu

N_IN, H1, H2, N_OUT = 784, 128, 64, 10
N_OUT_PAD = 128  # lane-dense padded output width (multiple of 128)


def mlp_kernel(x_ref, w1_ref, b1_ref, w2_ref, b2_ref, w3_ref, b3_ref, o_ref):
    # In-kernel f32 -> bf16 cast of the activation tile (hidden under the DMA).
    x = x_ref[...].astype(jnp.bfloat16)
    # fc1 + ReLU (bf16 operands, f32 accumulation on the MXU)
    h1 = jnp.dot(x, w1_ref[...], preferred_element_type=jnp.float32)
    h1 = jnp.maximum(h1 + b1_ref[...], 0.0)
    # fc2 + ReLU
    h2 = jnp.dot(h1.astype(jnp.bfloat16), w2_ref[...],
                 preferred_element_type=jnp.float32)
    h2 = jnp.maximum(h2 + b2_ref[...], 0.0)
    # fc3 (no activation) — output padded to 128 lanes (cols 10..127 are zeros)
    o_ref[...] = (
        jnp.dot(h2.astype(jnp.bfloat16), w3_ref[...],
                preferred_element_type=jnp.float32)
        + b3_ref[...]
    )


def prepare_params(w1, b1, w2, b2, w3, b3):
    """One-time weight prep (bf16 cast + lane padding), hoisted out of the hot path.

    Weights are stored as (in_features, out_features) so the kernel computes
    x @ W + b == nn.Linear(x) with W = W_pt.T.
    """
    w1b = w1.astype(jnp.bfloat16)
    w2b = w2.astype(jnp.bfloat16)
    w3p = jnp.zeros((H2, N_OUT_PAD), jnp.bfloat16).at[:, :N_OUT].set(
        w3.astype(jnp.bfloat16))
    b1r = jnp.asarray(b1, jnp.float32).reshape(1, H1)
    b2r = jnp.asarray(b2, jnp.float32).reshape(1, H2)
    b3p = jnp.zeros((1, N_OUT_PAD), jnp.float32).at[:, :N_OUT].set(
        jnp.asarray(b3, jnp.float32).reshape(1, N_OUT))
    return w1b, b1r, w2b, b2r, w3p, b3p


@functools.partial(jax.jit, static_argnames=("block_b",))
def two_layer_fc_pallas(x, w1b, b1, w2b, b2, w3p, b3p, *, block_b=2048):
    """x: (B, 1, 28, 28) float32 -> (B, 10) float32. Params from prepare_params()."""
    B = x.shape[0]
    x_flat = x.reshape(B, -1)  # (B, 784) f32; bf16 cast happens inside the kernel

    # Batch tile: multiple of 8 sublanes; no pad-to-tile copy — ragged last
    # block is handled by Pallas (OOB reads unspecified, OOB writes masked).
    tb = min(block_b, max(8, ((B + 7) // 8) * 8))
    grid = (pl.cdiv(B, tb),)

    const2d = lambda i: (0, 0)  # weights/biases: same block every step -> VMEM-resident

    flops = 2 * B * (N_IN * H1 + H1 * H2 + H2 * N_OUT_PAD)
    bytes_accessed = (
        B * (N_IN * 4 + N_OUT_PAD * 4)                       # x read + logits write
        + 2 * (N_IN * H1 + H1 * H2 + H2 * N_OUT_PAD)         # bf16 weights
        + 4 * (H1 + H2 + N_OUT_PAD)                          # f32 biases
    )

    out_padded = pl.pallas_call(
        mlp_kernel,
        out_shape=jax.ShapeDtypeStruct((B, N_OUT_PAD), jnp.float32),
        grid=grid,
        in_specs=[
            pl.BlockSpec((tb, N_IN), lambda i: (i, 0)),   # x tile (f32, pipelined)
            pl.BlockSpec((N_IN, H1), const2d),            # w1 (bf16)
            pl.BlockSpec((1, H1), const2d),               # b1 (f32)
            pl.BlockSpec((H1, H2), const2d),              # w2 (bf16)
            pl.BlockSpec((1, H2), const2d),               # b2 (f32)
            pl.BlockSpec((H2, N_OUT_PAD), const2d),       # w3 (bf16, lane-padded)
            pl.BlockSpec((1, N_OUT_PAD), const2d),        # b3 (f32, lane-padded)
        ],
        out_specs=pl.BlockSpec((tb, N_OUT_PAD), lambda i: (i, 0)),
        compiler_params=pltpu.CompilerParams(
            dimension_semantics=("parallel",),  # megacore sharding on v7x
            vmem_limit_bytes=32 << 20,
        ),
        cost_estimate=pl.CostEstimate(
            flops=flops, transcendentals=0, bytes_accessed=bytes_accessed),
    )(x_flat, w1b, b1, w2b, b2, w3p, b3p)

    # De-pad the lane dimension back to 10 logits (rows already exact: no B pad).
    return out_padded[:, :N_OUT]


def init_params(key):
    k1, k2, k3, k4, k5, k6 = jax.random.split(key, 6)

    # Deterministic synthetic init (uniform, roughly like PyTorch's default scale).
    def unif(k, shape, fan_in):
        bound = 1.0 / jnp.sqrt(fan_in)
        return jax.random.uniform(k, shape, jnp.float32, -bound, bound)

    w1 = unif(k1, (N_IN, H1), N_IN)
    b1 = unif(k2, (1, H1), N_IN)
    w2 = unif(k3, (H1, H2), H1)
    b2 = unif(k4, (1, H2), H1)
    w3 = unif(k5, (N_IN if False else H2, N_OUT), H2)
    b3 = unif(k6, (1, N_OUT), H2)
    return w1, b1, w2, b2, w3, b3


if __name__ == "__main__":
    key = jax.random.PRNGKey(0)
    kx, kp = jax.random.split(key)
    B = 2
    x = jax.random.normal(kx, (B, 1, 28, 28), jnp.float32)  # NCHW, flattens to 784
    raw_params = init_params(kp)

    prepped = prepare_params(*raw_params)          # one-time cast/pad
    out = two_layer_fc_pallas(x, *prepped)
    out = jax.block_until_ready(out)
    assert out.shape == (B, N_OUT)

    # Pure-JAX reference with the same precision policy as the kernel
    # (bf16 operands, f32 accumulation, f32 biases).
    w1, b1, w2, b2, w3, b3 = raw_params
    xf = x.reshape(B, -1).astype(jnp.bfloat16)
    h1 = jnp.maximum(
        jnp.dot(xf, w1.astype(jnp.bfloat16),
                preferred_element_type=jnp.float32) + b1, 0.0)
    h2 = jnp.maximum(
        jnp.dot(h1.astype(jnp.bfloat16), w2.astype(jnp.bfloat16),
                preferred_element_type=jnp.float32) + b2, 0.0)
    ref = jnp.dot(h2.astype(jnp.bfloat16), w3.astype(jnp.bfloat16),
                  preferred_element_type=jnp.float32) + b3

    max_err = float(jnp.max(jnp.abs(out - ref)))
    assert jnp.allclose(out, ref, atol=5e-3, rtol=5e-3), max_err
    print("KERNEL_OK")
</pallas_src>

<mosaic_0001>
module attributes {stable_mosaic.version = 11 : i64} {
  func.func @mlp_kernel(%arg0: i32, %arg1: memref<8x784xf32, #tpu.memory_space<vmem>>, %arg2: memref<784x128xbf16, #tpu.memory_space<vmem>>, %arg3: memref<1x128xf32, #tpu.memory_space<vmem>>, %arg4: memref<128x64xbf16, #tpu.memory_space<vmem>>, %arg5: memref<1x64xf32, #tpu.memory_space<vmem>>, %arg6: memref<64x128xbf16, #tpu.memory_space<vmem>>, %arg7: memref<1x128xf32, #tpu.memory_space<vmem>>, %arg8: memref<8x128xf32, #tpu.memory_space<vmem>>) attributes {dimension_semantics = [#tpu.dimension_semantics<parallel>], iteration_bounds = array<i64: 1>, scalar_prefetch = 0 : i64, scratch_operands = 0 : i64, tpu.core_type = #tpu.core_type<tc>, window_params = [{transform_indices = @transform_0, window_bounds = array<i64: 8, 784>}, {pipeline_mode = #tpu.pipeline_mode<synchronous>, transform_indices = @transform_1, window_bounds = array<i64: 784, 128>}, {pipeline_mode = #tpu.pipeline_mode<synchronous>, transform_indices = @transform_2, window_bounds = array<i64: 1, 128>}, {pipeline_mode = #tpu.pipeline_mode<synchronous>, transform_indices = @transform_3, window_bounds = array<i64: 128, 64>}, {pipeline_mode = #tpu.pipeline_mode<synchronous>, transform_indices = @transform_4, window_bounds = array<i64: 1, 64>}, {pipeline_mode = #tpu.pipeline_mode<synchronous>, transform_indices = @transform_5, window_bounds = array<i64: 64, 128>}, {pipeline_mode = #tpu.pipeline_mode<synchronous>, transform_indices = @transform_6, window_bounds = array<i64: 1, 128>}, {transform_indices = @transform_7, window_bounds = array<i64: 8, 128>}]} {
    %c0 = arith.constant 0 : index
    %c0_0 = arith.constant 0 : index
    %0 = vector.load %arg1[%c0, %c0_0] : memref<8x784xf32, #tpu.memory_space<vmem>>, vector<8x784xf32>
    %1 = arith.truncf %0 : vector<8x784xf32> to vector<8x784xbf16>
    %c0_1 = arith.constant 0 : index
    %c0_2 = arith.constant 0 : index
    %2 = vector.load %arg2[%c0_1, %c0_2] : memref<784x128xbf16, #tpu.memory_space<vmem>>, vector<784x128xbf16>
    %cst = arith.constant dense<0.000000e+00> : vector<8x128xf32>
    %3 = tpu.matmul %1, %2, %cst {dimension_numbers = #tpu.dot_dimension_numbers<[1], [0], [0], [1], [0, 0, 1, 1], [], []>} : vector<8x784xbf16>, vector<784x128xbf16>, vector<8x128xf32> -> vector<8x128xf32>
    %c0_3 = arith.constant 0 : index
    %c0_4 = arith.constant 0 : index
    %4 = vector.load %arg3[%c0_3, %c0_4] : memref<1x128xf32, #tpu.memory_space<vmem>>, vector<1x128xf32>
    %5 = vector.broadcast %4 : vector<1x128xf32> to vector<8x128xf32>
    %6 = arith.addf %3, %5 : vector<8x128xf32>
    %cst_5 = arith.constant 0.000000e+00 : f32
    %7 = vector.broadcast %cst_5 : f32 to vector<8x128xf32>
    %8 = arith.maximumf %6, %7 : vector<8x128xf32>
    %9 = arith.truncf %8 : vector<8x128xf32> to vector<8x128xbf16>
    %c0_6 = arith.constant 0 : index
    %c0_7 = arith.constant 0 : index
    %10 = vector.load %arg4[%c0_6, %c0_7] : memref<128x64xbf16, #tpu.memory_space<vmem>>, vector<128x64xbf16>
    %cst_8 = arith.constant dense<0.000000e+00> : vector<8x64xf32>
    %11 = tpu.matmul %9, %10, %cst_8 {dimension_numbers = #tpu.dot_dimension_numbers<[1], [0], [0], [1], [0, 0, 1, 1], [], []>} : vector<8x128xbf16>, vector<128x64xbf16>, vector<8x64xf32> -> vector<8x64xf32>
    %c0_9 = arith.constant 0 : index
    %c0_10 = arith.constant 0 : index
    %12 = vector.load %arg5[%c0_9, %c0_10] : memref<1x64xf32, #tpu.memory_space<vmem>>, vector<1x64xf32>
    %13 = vector.broadcast %12 : vector<1x64xf32> to vector<8x64xf32>
    %14 = arith.addf %11, %13 : vector<8x64xf32>
    %cst_11 = arith.constant 0.000000e+00 : f32
    %15 = vector.broadcast %cst_11 : f32 to vector<8x64xf32>
    %16 = arith.maximumf %14, %15 : vector<8x64xf32>
    %17 = arith.truncf %16 : vector<8x64xf32> to vector<8x64xbf16>
    %c0_12 = arith.constant 0 : index
    %c0_13 = arith.constant 0 : index
    %18 = vector.load %arg6[%c0_12, %c0_13] : memref<64x128xbf16, #tpu.memory_space<vmem>>, vector<64x128xbf16>
    %cst_14 = arith.constant dense<0.000000e+00> : vector<8x128xf32>
    %19 = tpu.matmul %17, %18, %cst_14 {dimension_numbers = #tpu.dot_dimension_numbers<[1], [0], [0], [1], [0, 0, 1, 1], [], []>} : vector<8x64xbf16>, vector<64x128xbf16>, vector<8x128xf32> -> vector<8x128xf32>
    %c0_15 = arith.constant 0 : index
    %c0_16 = arith.constant 0 : index
    %20 = vector.load %arg7[%c0_15, %c0_16] : memref<1x128xf32, #tpu.memory_space<vmem>>, vector<1x128xf32>
    %21 = vector.broadcast %20 : vector<1x128xf32> to vector<8x128xf32>
    %22 = arith.addf %19, %21 : vector<8x128xf32>
    %c0_17 = arith.constant 0 : index
    %c0_18 = arith.constant 0 : index
    %23 = vector.load %arg8[%c0_17, %c0_18] : memref<8x128xf32, #tpu.memory_space<vmem>>, vector<8x128xf32>
    tpu.vector_store %arg8[%c0_17, %c0_18], %22 {strides = array<i32>} : memref<8x128xf32, #tpu.memory_space<vmem>>, vector<8x128xf32>,
    return
  }
  func.func @transform_0(%arg0: i32) -> (i32, i32) {
    %c0_i32 = arith.constant 0 : i32
    %c0_i32_0 = arith.constant 0 : i32
    return %arg0, %c0_i32 : i32, i32
  }
  func.func @transform_1(%arg0: i32) -> (i32, i32) {
    %c0_i32 = arith.constant 0 : i32
    %c0_i32_0 = arith.constant 0 : i32
    %c0_i32_1 = arith.constant 0 : i32
    return %c0_i32, %c0_i32_0 : i32, i32
  }
  func.func @transform_2(%arg0: i32) -> (i32, i32) {
    %c0_i32 = arith.constant 0 : i32
    %c0_i32_0 = arith.constant 0 : i32
    %c0_i32_1 = arith.constant 0 : i32
    return %c0_i32, %c0_i32_0 : i32, i32
  }
  func.func @transform_3(%arg0: i32) -> (i32, i32) {
    %c0_i32 = arith.constant 0 : i32
    %c0_i32_0 = arith.constant 0 : i32
    %c0_i32_1 = arith.constant 0 : i32
    return %c0_i32, %c0_i32_0 : i32, i32
  }
  func.func @transform_4(%arg0: i32) -> (i32, i32) {
    %c0_i32 = arith.constant 0 : i32
    %c0_i32_0 = arith.constant 0 : i32
    %c0_i32_1 = arith.constant 0 : i32
    return %c0_i32, %c0_i32_0 : i32, i32
  }
  func.func @transform_5(%arg0: i32) -> (i32, i32) {
    %c0_i32 = arith.constant 0 : i32
    %c0_i32_0 = arith.constant 0 : i32
    %c0_i32_1 = arith.constant 0 : i32
    return %c0_i32, %c0_i32_0 : i32, i32
  }
  func.func @transform_6(%arg0: i32) -> (i32, i32) {
    %c0_i32 = arith.constant 0 : i32
    %c0_i32_0 = arith.constant 0 : i32
    %c0_i32_1 = arith.constant 0 : i32
    return %c0_i32, %c0_i32_0 : i32, i32
  }
  func.func @transform_7(%arg0: i32) -> (i32, i32) {
    %c0_i32 = arith.constant 0 : i32
    %c0_i32_0 = arith.constant 0 : i32
    return %arg0, %c0_i32 : i32, i32
  }
}

</mosaic_0001>

<bundles_post_ra>
// kernel: two_layer_fc_pallas.1
= control target key start
LH: loop header
LB: loop body
LE: loop exit
PB: predicated region body
PF: predicated region fallthrough
CT: control target
= control target key end

     0   :  { %12 = vsyncpa [#allocation3], 0  ;;  %s1388_s0 = inlined_call_operand.vmem [shape: f32[2,784], index: 0, kind: input, shape index: {}]   ;;  %s1389_s1 = inlined_call_operand.hbm [shape: bf16[784,128], index: 1, kind: input, shape index: {}]   ;;  %s1390_s2 = inlined_call_operand.vmem [shape: f32[1,128], index: 2, kind: input, shape index: {}]   ;;  %s1391_s3 = inlined_call_operand.vmem [shape: bf16[128,64], index: 3, kind: input, shape index: {}]   ;;  %s1392_s4 = inlined_call_operand.vmem [shape: f32[1,64], index: 4, kind: input, shape index: {}]   ;;  %s1393_s5 = inlined_call_operand.vmem [shape: bf16[64,128], index: 5, kind: input, shape index: {}]   ;;  %s1394_s6 = inlined_call_operand.vmem [shape: f32[1,128], index: 6, kind: input, shape index: {}]   ;;  %s1395_s7 = inlined_call_operand.hbm [shape: f32[2,128], index: 7, kind: output, shape index: {}]  }
   0x1   :  { %13 = vsyncpa [#allocation4], 0  ;;  %s1234_s24 = smov [#allocation2]  }
   0x2   :  { %s21_s25 = sshll.u32 %s1234_s24, 4  ;;  %s22_s25 = int_to_ptr.vmem [resolvable:$true] %s21_s25 }
   0x3   :  { %s1198_s26 = scalar_lea.vmem %s22_s25, 6272  ;;  %p1203_p1 = scmp.lt.s32.totalorder %s22_s25, %s22_s25 }
   0x4   :  { %p1199_p0 = scmp.ne.s32.totalorder %s22_s25, %s1198_s26  ;;  %p1204_p2 = scmp.lt.s32.totalorder %s1198_s26, %s1198_s26 }
   0x6   :  { %p1205_p3 = por %p1204_p2, %p1203_p1 }
   0x8   :  { %p1206_p4 = pnand %p1205_p3, %p1199_p0 }
   0xa   :  { %1209 = shalt.err (!%p1206_p4)
}
   0xb   :  { %s1235_s27 = smov 64   ;;  %s1236_s28 = smov 4  }
   0xc   :  { %27 = dma.hbm_to_vmem [thread:$0]  %s1389_s1, 6272, %s22_s25, [#allocation3], %s1235_s27, %s1235_s27, %s1236_s28  }
   0xd   :  { %1230 = dma.done.wait [#allocation3], 6272  }
   0xe   :  { %1231 = vsyncadd [#allocation3], 4294961024  ;;  %v1117_v0 = vld [vmem:[#allocation2 + $0x78] sm:$0xff]   ;;  %v1121_v4 = vld [vmem:[#allocation2 + $0x70] sm:$0xff]   ;;  %v1237_v23 = vmov 1983009808   ;;  %v65_v25 = vlaneseq }
   0xf   :  { %v1118_v1 = vld [vmem:[#allocation2 + $0x38] sm:$0xff]   ;;  %988 = vmatprep.subr.bf16.mxu0 %v1117_v0  ;;  %v1122_v5 = vld [vmem:[#allocation2 + $0x30] sm:$0xff]   ;;  %v1125_v8 = vld [vmem:[#allocation2 + $0x68] sm:$0xff]   ;;  %v63_v24 = vunpack.c.l.s4 %v1237_v23  ;;  %v1238_v47 = vmov 0.0   ;;  %vm1239_vm0 = vmmov 0   ;;  %vm542_vm1 = vcmask 130048  }
  0x10   :  { %v1119_v2 = vld [vmem:[#allocation2 + $0xf8] sm:$0xff]   ;;  %989 = vmatpush3.bf16.msra.mxu0 %v1118_v1  ;;  %v1123_v6 = vld [vmem:[#allocation2 + $0xf0] sm:$0xff]   ;;  %v1126_v9 = vld [vmem:[#allocation2 + $0x28] sm:$0xff]   ;;  %v66_v31 = vshrl.u32 %v65_v25, 7  ;;  %vm860_vm2 = vcmask 523264  }
  0x11   :  { %v1120_v3 = vld [vmem:[#allocation2 + $0xb8] sm:$0xff]   ;;  %1010 = vmatprep.subr.bf16.mxu1 %v1119_v2  ;;  %990 = vmatprep.subr.bf16.mxu0 %v1121_v4  ;;  %v1124_v7 = vld [vmem:[#allocation2 + $0xb0] sm:$0xff]   ;;  %v1127_v10 = vld [vmem:[#allocation2 + $0xe8] sm:$0xff]   ;;  %v64_v30 = vunpack.c.0.s8 %v63_v24 }
  0x12   :  { %1011 = vmatpush3.bf16.msra.mxu1 %v1120_v3  ;;  %v1128_v11 = vld [vmem:[#allocation2 + $0xa8] sm:$0xff]   ;;  %v1129_v12 = vld [vmem:[#allocation2 + $0x60] sm:$0xff]   ;;  %v1133_v16 = vld [vmem:[#allocation2 + $0x58] sm:$0xff]  }
  0x13   :  { %1012 = vmatprep.subr.bf16.mxu1 %v1123_v6  ;;  %v1130_v13 = vld [vmem:[#allocation2 + $0x20] sm:$0xff]   ;;  %v1134_v17 = vld [vmem:[#allocation2 + $0x18] sm:$0xff]   ;;  %v1137_v20 = vld [vmem:[#allocation2 + $0x50] sm:$0xff]   ;;  %v1286_v36 = vsub.s32 %v64_v30, %v66_v31 }
  0x14   :  { %991 = vmatpush3.bf16.msra.mxu0 %v1122_v5  ;;  %v1131_v14 = vld [vmem:[#allocation2 + $0xe0] sm:$0xff]   ;;  %v1135_v18 = vld [vmem:[#allocation2 + $0xd8] sm:$0xff]   ;;  %v1138_v21 = vld [vmem:[#allocation2 + $0x10] sm:$0xff]  }
  0x15   :  { %992 = vmatprep.subr.bf16.mxu0 %v1125_v8  ;;  %v1132_v15 = vld [vmem:[#allocation2 + $0xa0] sm:$0xff]   ;;  %v1136_v19 = vld [vmem:[#allocation2 + $0x98] sm:$0xff]   ;;  %v1139_v22 = vld [vmem:[#allocation2 + $0xd0] sm:$0xff]  }
  0x16   :  { %1013 = vmatpush3.bf16.msra.mxu1 %v1124_v7  ;;  %v1140_v26 = vld [vmem:[#allocation2 + $0x90] sm:$0xff]   ;;  %v1141_v27 = vld [vmem:[#allocation2 + $0x48] sm:$0xff]   ;;  %v1145_v33 = vld [vmem:[#allocation2 + $0x40] sm:$0xff]  }
  0x17   :  { %1014 = vmatprep.subr.bf16.mxu1 %v1127_v10  ;;  %v1142_v28 = vld [vmem:[#allocation2 + $0x8] sm:$0xff]   ;;  %v1146_v34 = vld [vmem:[#allocation2] sm:$0xff]   ;;  %v1153_v42 = vld [vmem:[#allocation2 + $0x178] sm:$0xff]  }
  0x18   :  { %993 = vmatpush3.bf16.msra.mxu0 %v1126_v9  ;;  %v1143_v29 = vld [vmem:[#allocation2 + $0xc8] sm:$0xff]   ;;  %v1147_v35 = vld [vmem:[#allocation2 + $0xc0] sm:$0xff]   ;;  %v1156_v52 = vld [vmem:[#allocation2 + $0x138] sm:$0xff]  }
  0x19   :  { %994 = vmatprep.subr.bf16.mxu0 %v1129_v12  ;;  %v1144_v32 = vld [vmem:[#allocation2 + $0x88] sm:$0xff]   ;;  %v1152_v39 = vld [vmem:[#allocation2 + $0x80] sm:$0xff]   ;;  %v1157_v55 = vld [vmem:[#allocation2 + $0x170] sm:$0xff]  }
  0x1a   :  { %1015 = vmatpush3.bf16.msra.mxu1 %v1128_v11  ;;  %v1148_v37 = vld [vmem:[%s1388_s0] ss:$14 sps:$4 sm:$0xff]   ;;  %v1150_v38 = vld [vmem:[%s1388_s0 + $0x1c] ss:$14 sps:$4 sm:$0xff]   ;;  %v1154_v43 = vld [vmem:[%s1388_s0 + $0x4] ss:$14 sps:$4 sm:$0xff]  }
  0x1b   :  { %1016 = vmatprep.subr.bf16.mxu1 %v1131_v14  ;;  %v68_v40 = vrot.slane %v1148_v37, %v1286_v36  ;;  %v82_v41 = vrot.slane %v1150_v38, %v1286_v36  ;;  %v1155_v44 = vld [vmem:[%s1388_s0 + $0x20] ss:$14 sps:$4 sm:$0xff]   ;;  %v75_v48 = vrot.slane %v1154_v43, %v1286_v36  ;;  %v1163_v63 = vld [vmem:[#allocation2 + $0x158] sm:$0xff]   ;;  %v1175_v5 = vld [vmem:[%s1388_s0 + $0x24] ss:$14 sps:$4 sm:$0xff]  }
  0x1c   :  { %995 = vmatpush3.bf16.msra.mxu0 %v1130_v13  ;;  %v89_v49 = vrot.slane %v1155_v44, %v1286_v36  ;;  %v1158_v58 = vld [vmem:[#allocation2 + $0x130] sm:$0xff]   ;;  %v1159_v59 = vld [vmem:[#allocation2 + $0x168] sm:$0xff]   ;;  %v1161_v61 = vld [vmem:[#allocation2 + $0x160] sm:$0xff]   ;;  %v118_v10 = vrot.slane %v1175_v5, %v1286_v36 }
  0x1d   :  { %996 = vmatprep.subr.bf16.mxu0 %v1133_v16  ;;  %v91_v45 = vcombine.high %v68_v40, %v82_v41  ;;  %v90_v46 = vcombine.low %v68_v40, %v82_v41  ;;  %v1160_v60 = vld [vmem:[#allocation2 + $0x128] sm:$0xff]   ;;  %v1162_v62 = vld [vmem:[#allocation2 + $0x120] sm:$0xff]   ;;  %v1164_v1 = vld [vmem:[#allocation2 + $0x118] sm:$0xff]  }
  0x1e   :  { %1017 = vmatpush3.bf16.msra.mxu1 %v1132_v15  ;;  %v93_v53 = vcombine.high %v75_v48, %v89_v49  ;;  %v92_v54 = vcombine.low %v75_v48, %v89_v49  ;;  %v1171_v0 = vld [vmem:[#allocation2 + $0x180] sm:$0xff]   ;;  %v1172_v2 = vld [vmem:[%s1388_s0 + $0x8] ss:$14 sps:$4 sm:$0xff]   ;;  %v1174_v3 = vld [vmem:[%s1388_s0 + $0xc] ss:$14 sps:$4 sm:$0x33]  }
  0x1f   :  { %1018 = vmatprep.subr.bf16.mxu1 %v1135_v18  ;;  %v137_v50 = vpack.c.bf16 %v91_v45, %v91_v45  ;;  %v136_v51 = vpack.c.bf16 %v90_v46, %v90_v46  ;;  %v1165_v4 = vld [vmem:[#allocation2 + $0x150] sm:$0xff]   ;;  %v104_v7 = vrot.slane %v1172_v2, %v1286_v36  ;;  %v111_v8 = vrot.slane %v1174_v3, %v1286_v36  ;;  %v1167_v12 = vld [vmem:[#allocation2 + $0x148] sm:$0xff]   ;;  %v1169_v18 = vld [vmem:[#allocation2 + $0x140] sm:$0xff]  }
  0x20   :  { %997 = vmatpush3.bf16.msra.mxu0 %v1134_v17  ;;  %v139_v56 = vpack.c.bf16 %v93_v53, %v93_v53  ;;  %v138_v57 = vpack.c.bf16 %v92_v54, %v92_v54  ;;  %v1177_v6 = vld [vmem:[%s1388_s0 + $0x28] ss:$14 sps:$4 sm:$0x33]   ;;  %v1181_v25 = vld [vmem:[%s1391_s3 + $0x20] sm:$0xff]   ;;  %v1186_v30 = vld [vmem:[%s1393_s5 + $0x18] sm:$0xff]  }
  0x21   :  { %998 = vmatprep.subr.bf16.mxu0 %v1137_v20  ;;  %578 = vmatprep.mubr.bf16.mxu0 %v137_v50  ;;  %v1166_v9 = vld [vmem:[#allocation2 + $0x110] sm:$0xff]   ;;  %v125_v11 = vrot.slane %v1177_v6, %v1286_v36  ;;  %v127_v13 = vcombine.high %v104_v7, %v118_v10  ;;  %v1168_v15 = vld [vmem:[#allocation2 + $0x108] sm:$0xff]   ;;  %v1170_v20 = vld [vmem:[#allocation2 + $0x100] sm:$0xff]  }
  0x22   :  { %1019 = vmatpush3.bf16.msra.mxu1 %v1136_v19  ;;  %618 = vmatprep.mubr.bf16.mxu1 %v139_v56  ;;  %v126_v19 = vcombine.low %v104_v7, %v118_v10  ;;  %v1179_v23 = vld [vmem:[%s1391_s3 + $0x30] sm:$0xff]   ;;  %v1180_v24 = vld [vmem:[%s1391_s3 + $0x28] sm:$0xff]   ;;  %v922_v44 = vld [vmem:[%s1390_s2] ss:$0 sm:$0xff] }
  0x23   :  { %1020 = vmatprep.subr.bf16.mxu1 %v1139_v22  ;;  %v128_v14 = vcombine.low %v111_v8, %v125_v11  ;;  %v141_v16 = vpack.c.bf16 %v127_v13, %v127_v13  ;;  %v1178_v22 = vld [vmem:[%s1391_s3 + $0x38] sm:$0xff]   ;;  %v1187_v31 = vld [vmem:[%s1393_s5 + $0x10] sm:$0xff]  }
  0x24   :  { %999 = vmatpush3.bf16.msra.mxu0 %v1138_v21  ;;  %v140_v21 = vpack.c.bf16 %v126_v19, %v126_v19 }
  0x25   :  { %1000 = vmatprep.subr.bf16.mxu0 %v1141_v27  ;;  %v142_v17 = vpack.c.bf16 %v128_v14, %v128_v14  ;;  %v1183_v27 = vld [vmem:[%s1391_s3 + $0x10] sm:$0xff]  }
  0x26   :  { %1021 = vmatpush3.bf16.msra.mxu1 %v1140_v26  ;;  %v1182_v26 = vld [vmem:[%s1391_s3 + $0x18] sm:$0xff]  }
  0x27   :  { %1022 = vmatprep.subr.bf16.mxu1 %v1143_v29  ;;  %v1185_v29 = vld [vmem:[%s1391_s3] sm:$0xff]  }
  0x28   :  { %1001 = vmatpush3.bf16.msra.mxu0 %v1142_v28  ;;  %v1184_v28 = vld [vmem:[%s1391_s3 + $0x8] sm:$0xff]  }
  0x29   :  { %1002 = vmatprep.subr.bf16.mxu0 %v1145_v33 }
  0x2a   :  { %1023 = vmatpush3.bf16.msra.mxu1 %v1144_v32 }
  0x2b   :  { %1024 = vmatprep.subr.bf16.mxu1 %v1147_v35 }
  0x2c   :  { %1003 = vmatpush3.bf16.msra.mxu0 %v1146_v34 }
  0x2d   :  { %1032 = vmatprep.subr.bf16.mxu0 %v1153_v42 }
  0x2e   :  { %1025 = vmatpush3.bf16.msra.mxu1 %v1152_v39 }
  0x2f   :  { %1070 = vmatprep.subr.bf16.mxu1 %v1238_v47  ;;  %579 = vmatmul.mubr.bf16.vlgmr.msra.gmra.mxu0 %v136_v51 }
  0x30   :  { %1033 = vmatpush3.bf16.msra.mxu0 %v1156_v52  ;;  %658 = vmatprep.mubr.bf16.mxu0 %v141_v16 }
  0x31   :  { %1034 = vmatprep.subr.bf16.mxu0 %v1157_v55  ;;  %619 = vmatmul.mubr.bf16.vlgmr.msra.gmra.mxu1 %v138_v57 }
  0x32   :  { %1072 = vmatprep.mubr.msk.bf16.mxu1 %vm1239_vm0, %v1238_v47  ;;  %1071 = vmatpush3.bf16.msra.mxu1 %v1171_v0 }
  0x33   :  { %1076 = vmatprep.subr.bf16.mxu1 %v1238_v47 }
  0x34   :  { %1035 = vmatpush3.bf16.msra.mxu0 %v1158_v58 }
  0x35   :  { %1036 = vmatprep.subr.bf16.mxu0 %v1159_v59  ;;  %v1188_v59 = vld [vmem:[%s1393_s5 + $0x8] sm:$0xff]  }
  0x38   :  { %1037 = vmatpush3.bf16.msra.mxu0 %v1160_v60  ;;  %v1189_v60 = vld [vmem:[%s1393_s5] sm:$0xff]  }
  0x39   :  { %1038 = vmatprep.subr.bf16.mxu0 %v1161_v61  ;;  %1073 = vmatmul.mubr.msk.bf16.vlgmr.msra.gmra.mxu1 %vm542_vm1, %v142_v17  ;;  %v973_v61 = vld [vmem:[%s1392_s4] ss:$0 sm:$0xff] }
  0x3a   :  { %1092 = vmatprep.mubr.msk.bf16.mxu1 %vm1239_vm0, %v1238_v47  ;;  %1077 = vmatpush3.bf16.msra.mxu1 %v1178_v22 }
  0x3b   :  { %1078 = vmatprep.subr.bf16.mxu1 %v1238_v47 }
  0x3c   :  { %1039 = vmatpush3.bf16.msra.mxu0 %v1162_v62 }
  0x3d   :  { %1040 = vmatprep.subr.bf16.mxu0 %v1163_v63 }
  0x3e   :  { %1079 = vmatpush3.bf16.msra.mxu1 %v1179_v23 }
  0x3f   :  { %1080 = vmatprep.subr.bf16.mxu1 %v1238_v47 }
  0x40   :  { %1041 = vmatpush3.bf16.msra.mxu0 %v1164_v1 }
  0x41   :  { %1042 = vmatprep.subr.bf16.mxu0 %v1165_v4 }
  0x42   :  { %1081 = vmatpush3.bf16.msra.mxu1 %v1180_v24 }
  0x43   :  { %1082 = vmatprep.subr.bf16.mxu1 %v1238_v47 }
  0x44   :  { %1043 = vmatpush3.bf16.msra.mxu0 %v1166_v9 }
  0x45   :  { %1044 = vmatprep.subr.bf16.mxu0 %v1167_v12 }
  0x46   :  { %1083 = vmatpush3.bf16.msra.mxu1 %v1181_v25 }
  0x47   :  { %1084 = vmatprep.subr.bf16.mxu1 %v1238_v47 }
  0x48   :  { %1045 = vmatpush3.bf16.msra.mxu0 %v1168_v15 }
  0x49   :  { %1046 = vmatprep.subr.bf16.mxu0 %v1169_v18 }
  0x4a   :  { %1085 = vmatpush3.bf16.msra.mxu1 %v1182_v26 }
  0x4b   :  { %1086 = vmatprep.subr.bf16.mxu1 %v1238_v47 }
  0x4c   :  { %1047 = vmatpush3.bf16.msra.mxu0 %v1170_v20 }
  0x4d   :  { %1096 = vmatprep.subr.bf16.mxu0 %v1238_v47 }
  0x4e   :  { %1087 = vmatpush3.bf16.msra.mxu1 %v1183_v27 }
  0x4f   :  { %659 = vmatmul.mubr.bf16.vlgmr.msra.gmra.mxu0 %v140_v21  ;;  %1088 = vmatprep.subr.bf16.mxu1 %v1238_v47 }
  0x50   :  { %1104 = vmatprep.mubr.msk.bf16.mxu0 %vm1239_vm0, %v1238_v47  ;;  %1097 = vmatpush3.bf16.msra.mxu0 %v1186_v30 }
  0x51   :  { %1098 = vmatprep.subr.bf16.mxu0 %v1238_v47 }
  0x52   :  { %1089 = vmatpush3.bf16.msra.mxu1 %v1184_v28 }
  0x53   :  { %1090 = vmatprep.subr.bf16.mxu1 %v1238_v47 }
  0x54   :  { %1099 = vmatpush3.bf16.msra.mxu0 %v1187_v31 }
  0x55   :  { %1100 = vmatprep.subr.bf16.mxu0 %v1238_v47 }
  0x56   :  { %1091 = vmatpush3.bf16.msra.mxu1 %v1185_v29 }
  0x58   :  { %1101 = vmatpush3.bf16.msra.mxu0 %v1188_v59 }
  0x59   :  { %1102 = vmatprep.subr.bf16.mxu0 %v1238_v47  ;;  %v982_v47 = vld [vmem:[%s1394_s6] ss:$0 sm:$0xff] }
  0x5c   :  { %1103 = vmatpush3.bf16.msra.mxu0 %v1189_v60 }
  0xef   :  { %v1004_v32 = vpop.f32.mrf.mxu0 }
  0xf1   :  { %v1005_v33 = vpop.f32.mrf.mxu0  ;;  %v1026_v34 = vpop.f32.mrf.mxu1 }
  0xf2   :  { %v1006_v43 = vadd.f32 %v1005_v33, %v1004_v32 }
  0xf3   :  { %v1007_v35 = vpop.f32.mrf.mxu0  ;;  %v1027_v36 = vpop.f32.mrf.mxu1 }
  0xf4   :  { %v581_v46 = vadd.f32 %v1006_v43, %v922_v44  ;;  %v1028_v48 = vadd.f32 %v1027_v36, %v1026_v34 }
  0xf5   :  { %v1008_v37 = vpop.f32.mrf.mxu0  ;;  %v1029_v38 = vpop.f32.mrf.mxu1 }
  0xf6   :  { %v621_v51 = vadd.f32 %v1028_v48, %v581_v46 }
  0xf7   :  { %v1030_v39 = vpop.f32.mrf.mxu1 }
  0xf9   :  { %v700_v40 = vpop.f32.mrf.mxu1 }
  0xfb   :  { %v1074_v41 = vpop.f32.mrf.mxu1 }
  0xfd   :  { %v703_v42 = vpop.f32.mrf.mxu1 }
  0xff   :  { %v1075_v45 = vpop.f32.mrf.mxu1 }
 0x10f   :  { %v1048_v49 = vpop.f32.mrf.mxu0 }
 0x111   :  { %v1049_v50 = vpop.f32.mrf.mxu0 }
 0x112   :  { %v1050_v52 = vadd.f32 %v1049_v50, %v1048_v49 }
 0x113   :  { %v1051_v53 = vpop.f32.mrf.mxu0 }
 0x114   :  { %v661_v54 = vadd.f32 %v1050_v52, %v621_v51 }
 0x115   :  { %v1052_v55 = vpop.f32.mrf.mxu0 }
 0x116   :  { %v701_v56 = vadd.f32 %v700_v40, %v661_v54 }
 0x118   :  { %v706_v57 = vmax.f32 %v701_v56, 0.0 }
 0x11a   :  { %v707_v58 = vpack.c.bf16 %v706_v57, %v706_v57 }
 0x11c   :  { %1093 = vmatmul.mubr.bf16.vlgmr.msra.gmra.mxu1 %v707_v58 }
 0x1dc   :  { %v813_v62 = vpop.f32.mrf.mxu1 }
 0x1dd   :  { %v814_v63 = vadd.f32 %v973_v61, %v813_v62 }
 0x1de   :  { %v1094_v0 = vpop.f32.mrf.mxu1 }
 0x1df   :  { %v819_v1 = vmax.f32 %v814_v63, 0.0 }
 0x1e0   :  { %v816_v2 = vpop.f32.mrf.mxu1 }
 0x1e1   :  { %v820_v3 = vpack.c.bf16 %v819_v1, %v819_v1 }
 0x1e2   :  { %v1095_v4 = vpop.f32.mrf.mxu1 }
 0x1e3   :  { %1105 = vmatmul.mubr.msk.bf16.vlgmr.msra.gmra.mxu0 %vm860_vm2, %v820_v3 }
 0x2a3   :  { %v898_v5 = vpop.f32.mrf.mxu0 }
 0x2a4   :  { %v899_v6 = vadd.f32 %v982_v47, %v898_v5 }
 0x2a5   :  { %v1106_v7 = vpop.f32.mrf.mxu0 }
 0x2a6   :  { %904 = vst [vmem:[#allocation5] sm:$0xff] %v899_v6 }
 0x2a7   :  { %v901_v8 = vpop.f32.mrf.mxu0 }
 0x2a9   :  { %v1107_v9 = vpop.f32.mrf.mxu0 }
 0x2aa   :  { %909 = vsyncadd [#allocation4], 96  ;;  %s1240_s4 = smov [#allocation5]  }
 0x2ab   :  { %s910_s5 = sshll.u32 %s1240_s4, 4  ;;  %s911_s5 = int_to_ptr.vmem [resolvable:$true] %s910_s5 }
 0x2ac   :  { %s1210_s25 = scalar_lea.vmem %s911_s5, 32  ;;  %s1214_s26 = scalar_lea.vmem %s911_s5, 128 }
 0x2ad   :  { %p1211_p5 = scmp.ne.s32.totalorder %s911_s5, %s1210_s25  ;;  %p1215_p6 = scmp.lt.s32.totalorder %s911_s5, %s911_s5 }
 0x2ae   :  { %p1216_p7 = scmp.lt.s32.totalorder %s1214_s26, %s1210_s25 }
 0x2b0   :  { %p1217_p8 = por %p1216_p7, %p1215_p6 }
 0x2b2   :  { %p1218_p9 = pnand %p1217_p8, %p1211_p5 }
 0x2b4   :  { %1221 = shalt.err (!%p1218_p9)
}
 0x2b5   :  { %s1241_s27 = smov 32   ;;  %s1242_s6 = smov 2  }
 0x2b6   :  { %916 = dma.vmem_to_hbm [thread:$0]  %s911_s5, 32, %s1395_s7, [#allocation4], %s1241_s27, %s1241_s27, %s1242_s6  }
 0x2b7   :  { %1232 = dma.done.wait [#allocation4], 128  }
 0x2b8   :  { %1233 = vsyncadd [#allocation4], 4294967168 }
 0x2b9   :  { %920 = vsyncpa [#allocation3], 1 }
 0x2ba   :  { %921 = vsyncpa [#allocation4], 1 }

</bundles_post_ra>
